<compile_context>
chip_gen: v6e
topology: v6e:2x2x1
jax: 0.10.0
libtpu: 0.0.40
codegen_flags: <defaults>
</compile_context>

<pallas_src>
import jax
import jax.numpy as jnp
from jax import lax
from jax.experimental import pallas as pl
from jax.experimental.pallas import tpu as pltpu

_HIDDEN = 16
# Batch-tile (lane) width.  8192 keeps the lane-padded x tile at 4 MiB per
# buffer (8 MiB double-buffered) — inside every generation's scoped-VMEM
# budget — while cutting per-grid-step overhead 4x vs the old 2048-wide tile.
_TB_MAX = 8192


def _round_up(n: int, m: int) -> int:
    return ((n + m - 1) // m) * m


def _mlp_kernel(x_ref, w1_ref, p_ref, o_ref):
    # x_ref:  (TB, D) f32  native-layout batch tile (one contiguous DMA stripe)
    # w1_ref: (H, D)       fc1 weight (torch layout); constant index_map => resident
    # p_ref:  (H, 3)       packed params: [:,0]=b1, [:,1]=w2 column, [0,2]=b2
    # o_ref:  (1, TB)      lane-dense sigmoid output tile
    p = p_ref[...]
    b1 = p[:, 0:1]          # (H, 1)
    w2 = p[:, 1:2]          # (H, 1)
    b2 = p[0:1, 2:3]        # (1, 1)

    # fc1 on the MXU in "NT" form: (H, D) . (TB, D)^T -> (H, TB).  Doing the
    # rearrangement in-kernel replaces the wrapper-side x.T (an extra full HBM
    # pass over x); the added XLU/MXU work hides under the tile DMA.
    h = lax.dot_general(
        w1_ref[...], x_ref[...],
        dimension_numbers=(((1,), (1,)), ((), ())),
        preferred_element_type=jnp.float32,
    )
    h = jnp.maximum(h + b1, 0.0)                      # bias + ReLU, lane-dense VPU work

    # fc2 as a VPU multiply + sublane reduce (avoids a 1-column MXU pass).
    # Reduction is over the hidden (sublane) axis only — never over the
    # (possibly garbage-padded) batch lanes.
    z = jnp.sum(h * w2, axis=0, keepdims=True) + b2   # (1, TB)

    # Numerically stable sigmoid: exp of a non-positive value never overflows;
    # exact reciprocal on a single (1, TB) vector is negligible.
    ez = jnp.exp(-jnp.abs(z))
    inv = 1.0 / (1.0 + ez)
    o_ref[...] = jnp.where(z >= 0.0, inv, ez * inv)


def heart_disease_forward(x, w1, b1, w2, b2):
    """Forward pass of HeartDiseaseModel.

    x: (B, D) f32; w1: (16, D); b1: (16,); w2: (1, 16); b2: (1,)  (torch layouts)
    returns: (B, 1) f32 probabilities.
    """
    B, D = x.shape
    H = w1.shape[0]

    # Lane-aligned batch tile; keep >= 2 grid steps when B allows so the
    # "parallel" axis can shard across v7x's two TensorCores.
    TB = min(_TB_MAX, _round_up(max(pl.cdiv(B, 2), 1), 128))
    grid = (pl.cdiv(B, TB),)   # ragged last block handled by Pallas masking

    # Fold the tiny fc1-bias / fc2-weight / fc2-bias into one (H, 3) operand so
    # we don't carry three separate lane-padded, double-buffered specs.
    params = jnp.concatenate(
        [b1.reshape(H, 1),
         w2.reshape(1, H).T,                        # (H, 1)
         jnp.broadcast_to(b2.reshape(1, 1), (H, 1))],
        axis=1,
    ).astype(jnp.float32)

    out = pl.pallas_call(
        _mlp_kernel,
        out_shape=jax.ShapeDtypeStruct((1, B), jnp.float32),
        grid=grid,
        in_specs=[
            pl.BlockSpec((TB, D), lambda i: (i, 0)),   # x, native layout (no x.T / no pad in HBM)
            pl.BlockSpec((H, D), lambda i: (0, 0)),    # w1 (resident across the grid)
            pl.BlockSpec((H, 3), lambda i: (0, 0)),    # packed b1 / w2 / b2
        ],
        out_specs=pl.BlockSpec((1, TB), lambda i: (0, i)),   # lane-dense output stores
        compiler_params=pltpu.CompilerParams(
            dimension_semantics=("parallel",),
            vmem_limit_bytes=32 * 1024 * 1024,
        ),
    )(x.astype(jnp.float32), w1.astype(jnp.float32), params)

    # Restore the (B, 1) torch output shape.
    return out[0, :].reshape(B, 1)


def init_params(key, input_dim, hidden=_HIDDEN):
    # Mimics nn.Linear's U(-1/sqrt(fan_in), 1/sqrt(fan_in)) init, torch layouts.
    k1, k2, k3, k4 = jax.random.split(key, 4)
    lim1 = 1.0 / jnp.sqrt(jnp.float32(input_dim))
    lim2 = 1.0 / jnp.sqrt(jnp.float32(hidden))
    w1 = jax.random.uniform(k1, (hidden, input_dim), jnp.float32, -lim1, lim1)
    b1 = jax.random.uniform(k2, (hidden,), jnp.float32, -lim1, lim1)
    w2 = jax.random.uniform(k3, (1, hidden), jnp.float32, -lim2, lim2)
    b2 = jax.random.uniform(k4, (1,), jnp.float32, -lim2, lim2)
    return w1, b1, w2, b2


if __name__ == "__main__":
    key = jax.random.PRNGKey(0)
    k_x, k_p = jax.random.split(key)

    batch, input_dim = 8, 13  # 13 features: classic heart-disease dataset
    x = jax.random.normal(k_x, (batch, input_dim), dtype=jnp.float32)
    w1, b1, w2, b2 = init_params(k_p, input_dim)

    out = heart_disease_forward(x, w1, b1, w2, b2)
    out = jax.block_until_ready(out)

    # Pure-JAX reference (torch forward semantics).
    ref = jax.nn.sigmoid(jnp.maximum(x @ w1.T + b1, 0.0) @ w2.T + b2)
    assert out.shape == (batch, 1)
    assert jnp.allclose(out, ref, atol=1e-3, rtol=1e-3), "mismatch vs reference"

    print("KERNEL_OK")
</pallas_src>

<mosaic_0001>
module attributes {stable_mosaic.version = 11 : i64} {
  func.func @_mlp_kernel(%arg0: i32, %arg1: memref<128x13xf32, #tpu.memory_space<vmem>>, %arg2: memref<16x13xf32, #tpu.memory_space<vmem>>, %arg3: memref<16x3xf32, #tpu.memory_space<vmem>>, %arg4: memref<1x128xf32, #tpu.memory_space<vmem>>) attributes {dimension_semantics = [#tpu.dimension_semantics<parallel>], iteration_bounds = array<i64: 1>, scalar_prefetch = 0 : i64, scratch_operands = 0 : i64, tpu.core_type = #tpu.core_type<tc>, window_params = [{transform_indices = @transform_0, window_bounds = array<i64: 128, 13>}, {pipeline_mode = #tpu.pipeline_mode<synchronous>, transform_indices = @transform_1, window_bounds = array<i64: 16, 13>}, {pipeline_mode = #tpu.pipeline_mode<synchronous>, transform_indices = @transform_2, window_bounds = array<i64: 16, 3>}, {transform_indices = @transform_3, window_bounds = array<i64: 1, 128>}]} {
    %c0 = arith.constant 0 : index
    %c0_0 = arith.constant 0 : index
    %0 = vector.load %arg3[%c0, %c0_0] : memref<16x3xf32, #tpu.memory_space<vmem>>, vector<16x3xf32>
    %1 = vector.extract_strided_slice %0 {offsets = [0, 0], sizes = [16, 1], strides = [1, 1]} : vector<16x3xf32> to vector<16x1xf32>
    %2 = vector.extract_strided_slice %0 {offsets = [0, 1], sizes = [16, 1], strides = [1, 1]} : vector<16x3xf32> to vector<16x1xf32>
    %3 = vector.extract_strided_slice %0 {offsets = [0, 2], sizes = [1, 1], strides = [1, 1]} : vector<16x3xf32> to vector<1x1xf32>
    %c0_1 = arith.constant 0 : index
    %c0_2 = arith.constant 0 : index
    %4 = vector.load %arg2[%c0_1, %c0_2] : memref<16x13xf32, #tpu.memory_space<vmem>>, vector<16x13xf32>
    %c0_3 = arith.constant 0 : index
    %c0_4 = arith.constant 0 : index
    %5 = vector.load %arg1[%c0_3, %c0_4] : memref<128x13xf32, #tpu.memory_space<vmem>>, vector<128x13xf32>
    %cst = arith.constant dense<0.000000e+00> : vector<16x128xf32>
    %6 = tpu.matmul %4, %5, %cst {dimension_numbers = #tpu.dot_dimension_numbers<[1], [1], [0], [0], [0, 0, 1, 0], [], []>} : vector<16x13xf32>, vector<128x13xf32>, vector<16x128xf32> -> vector<16x128xf32>
    %7 = vector.broadcast %1 : vector<16x1xf32> to vector<16x128xf32>
    %8 = arith.addf %6, %7 : vector<16x128xf32>
    %cst_5 = arith.constant 0.000000e+00 : f32
    %9 = vector.broadcast %cst_5 : f32 to vector<16x128xf32>
    %10 = arith.maximumf %8, %9 : vector<16x128xf32>
    %11 = vector.broadcast %2 : vector<16x1xf32> to vector<16x128xf32>
    %12 = arith.mulf %10, %11 : vector<16x128xf32>
    %cst_6 = arith.constant dense<0.000000e+00> : vector<128xf32>
    %13 = vector.multi_reduction <add>, %12, %cst_6 [0] : vector<16x128xf32> to vector<128xf32>
    %14 = vector.shape_cast %13 : vector<128xf32> to vector<1x128xf32>
    %15 = vector.broadcast %3 : vector<1x1xf32> to vector<1x128xf32>
    %16 = arith.addf %14, %15 : vector<1x128xf32>
    %17 = math.absf %16 : vector<1x128xf32>
    %cst_7 = arith.constant 0.000000e+00 : f32
    %18 = vector.broadcast %cst_7 : f32 to vector<1x128xf32>
    %19 = arith.subf %18, %17 : vector<1x128xf32>
    %20 = math.exp %19 : vector<1x128xf32>
    %cst_8 = arith.constant 1.000000e+00 : f32
    %21 = vector.broadcast %cst_8 : f32 to vector<1x128xf32>
    %22 = arith.addf %21, %20 : vector<1x128xf32>
    %cst_9 = arith.constant 1.000000e+00 : f32
    %23 = vector.broadcast %cst_9 : f32 to vector<1x128xf32>
    %24 = arith.divf %23, %22 : vector<1x128xf32>
    %cst_10 = arith.constant 0.000000e+00 : f32
    %25 = vector.broadcast %cst_10 : f32 to vector<1x128xf32>
    %26 = arith.cmpf oge, %16, %25 : vector<1x128xf32>
    %27 = arith.mulf %20, %24 : vector<1x128xf32>
    %28 = arith.select %26, %24, %27 : vector<1x128xi1>, vector<1x128xf32>
    %c0_11 = arith.constant 0 : index
    %c0_12 = arith.constant 0 : index
    %29 = vector.load %arg4[%c0_11, %c0_12] : memref<1x128xf32, #tpu.memory_space<vmem>>, vector<1x128xf32>
    tpu.vector_store %arg4[%c0_11, %c0_12], %28 {strides = array<i32>} : memref<1x128xf32, #tpu.memory_space<vmem>>, vector<1x128xf32>,
    return
  }
  func.func @transform_0(%arg0: i32) -> (i32, i32) {
    %c0_i32 = arith.constant 0 : i32
    %c0_i32_0 = arith.constant 0 : i32
    return %arg0, %c0_i32 : i32, i32
  }
  func.func @transform_1(%arg0: i32) -> (i32, i32) {
    %c0_i32 = arith.constant 0 : i32
    %c0_i32_0 = arith.constant 0 : i32
    %c0_i32_1 = arith.constant 0 : i32
    return %c0_i32, %c0_i32_0 : i32, i32
  }
  func.func @transform_2(%arg0: i32) -> (i32, i32) {
    %c0_i32 = arith.constant 0 : i32
    %c0_i32_0 = arith.constant 0 : i32
    %c0_i32_1 = arith.constant 0 : i32
    return %c0_i32, %c0_i32_0 : i32, i32
  }
  func.func @transform_3(%arg0: i32) -> (i32, i32) {
    %c0_i32 = arith.constant 0 : i32
    %c0_i32_0 = arith.constant 0 : i32
    return %c0_i32, %arg0 : i32, i32
  }
}

</mosaic_0001>

<bundles_post_ra>
// kernel: tpu_custom_call.1
= control target key start
LH: loop header
LB: loop body
LE: loop exit
PB: predicated region body
PF: predicated region fallthrough
CT: control target
= control target key end

     0   :  { %8 = vsyncpa [#allocation3], 0  ;;  %s447_s0 = inlined_call_operand.hbm [shape: f32[8,13], index: 0, kind: input, shape index: {}]   ;;  %s448_s1 = inlined_call_operand.vmem [shape: f32[16,13], index: 1, kind: input, shape index: {}]   ;;  %s449_s2 = inlined_call_operand.vmem [shape: f32[16,3], index: 2, kind: input, shape index: {}]   ;;  %s450_s3 = inlined_call_operand.hbm [shape: f32[1,8], index: 3, kind: output, shape index: {}]  }
   0x1   :  { %9 = vsyncpa [#allocation4], 0 }
   0x2   :  { %14 = vsyncadd [#allocation3], 1920  ;;  %s368_s12 = smov [#allocation2]  }
   0x3   :  { %s15_s13 = sshll.u32 %s368_s12, 4  ;;  %s16_s13 = int_to_ptr.vmem [resolvable:$true] %s15_s13 }
   0x4   :  { %s332_s14 = scalar_lea.vmem %s16_s13, 128  ;;  %s336_s15 = scalar_lea.vmem %s16_s13, 2048 }
   0x5   :  { %p333_p0 = scmp.ne.s32.totalorder %s16_s13, %s332_s14  ;;  %p337_p1 = scmp.lt.s32.totalorder %s16_s13, %s16_s13 }
   0x6   :  { %p338_p2 = scmp.lt.s32.totalorder %s336_s15, %s332_s14 }
   0x8   :  { %p339_p3 = por %p338_p2, %p337_p1 }
   0xa   :  { %p340_p4 = pnand %p339_p3, %p333_p0 }
   0xc   :  { %343 = shalt.err (!%p340_p4)
}
   0xd   :  { %s369_s16 = smov 128   ;;  %s370_s17 = smov 8  }
   0xe   :  { %21 = dma.hbm_to_vmem [thread:$0]  %s447_s0, 128, %s16_s13, [#allocation3], %s369_s16, %s369_s16, %s370_s17  }
   0xf   :  { %364 = dma.done.wait [#allocation3], 2048  }
  0x10   :  { %365 = vsyncadd [#allocation3], 4294965248  ;;  %v371_v0 = vmov 0   ;;  %v372_v1 = vmov 1   ;;  %vm59_vm0 = vcmask 105472   ;;  %v48_v2 = vld [vmem:[#allocation2 + $0x78] sm:$0xff] }
  0x11   :  { %317 = vset.pattern.permute.xlu0 %v371_v0  ;;  %318 = vset.pattern.permute.xlu1 %v372_v1  ;;  %v47_v3 = vld [vmem:[#allocation2 + $0x70] sm:$0xff]  ;;  %v46_v4 = vld [vmem:[#allocation2 + $0x68] sm:$0xff]  ;;  %v31_v5 = vld [vmem:[%s448_s1] sm:$0xff]  ;;  %v373_v10 = vmov 2  }
  0x12   :  { %275 = vmatprep.subr.msk.mxu0 %vm59_vm0, %v48_v2  ;;  %307 = vmatprep.mubr.msk.f32.mxu0 %vm59_vm0, %v31_v5  ;;  %v29_v6 = vld [vmem:[%s449_s2] sm:$0xff]  ;;  %v30_v8 = vld [vmem:[%s449_s2 + $0x8] sm:$0xff]  ;;  %v44_v9 = vld [vmem:[#allocation2 + $0x58] sm:$0xff] }
  0x13   :  { %276 = vmatpush3.xpose.msk.msra.mxu0 %vm59_vm0, %v48_v2  ;;  %51 = vperm.xlu0 %317, %v29_v6   ;;  %v45_v7 = vld [vmem:[#allocation2 + $0x60] sm:$0xff]  ;;  %v43_v11 = vld [vmem:[#allocation2 + $0x50] sm:$0xff]  ;;  %v42_v12 = vld [vmem:[#allocation2 + $0x48] sm:$0xff] }
  0x14   :  { %277 = vmatprep.subr.msk.mxu0 %vm59_vm0, %v47_v3  ;;  %192 = vperm.xlu1 %318, %v29_v6   ;;  %v41_v13 = vld [vmem:[#allocation2 + $0x40] sm:$0xff]  ;;  %v40_v14 = vld [vmem:[#allocation2 + $0x38] sm:$0xff]  ;;  %v39_v15 = vld [vmem:[#allocation2 + $0x30] sm:$0xff] }
  0x15   :  { %v38_v16 = vld [vmem:[#allocation2 + $0x28] sm:$0xff]  ;;  %v37_v17 = vld [vmem:[#allocation2 + $0x20] sm:$0xff]  ;;  %v36_v18 = vld [vmem:[#allocation2 + $0x18] sm:$0xff] }
  0x16   :  { %v35_v19 = vld [vmem:[#allocation2 + $0x10] sm:$0xff]  ;;  %v34_v20 = vld [vmem:[#allocation2 + $0x8] sm:$0xff]  ;;  %v33_v21 = vld [vmem:[#allocation2] sm:$0xff] }
  0x17   :  { %278 = vmatpush3.xpose.msk.msra.mxu0 %vm59_vm0, %v47_v3  ;;  %56 = vperm.xlu0 %317, %v30_v8   ;;  %v32_v22 = vld [vmem:[%s448_s1 + $0x8] sm:$0xff]  ;;  %s374_s1 = smov [#allocation5]  }
  0x18   :  { %279 = vmatprep.subr.msk.mxu0 %vm59_vm0, %v46_v4  ;;  %196 = vperm.xlu1 %318, %v30_v8   ;;  %s230_s26 = sshll.u32 %s374_s1, 4  ;;  %s231_s26 = int_to_ptr.vmem [resolvable:$true] %s230_s26 }
  0x19   :  { %s344_s27 = scalar_lea.vmem %s231_s26, 16  ;;  %s348_s28 = scalar_lea.vmem %s231_s26, 32 }
  0x1a   :  { %p345_p5 = scmp.ne.s32.totalorder %s231_s26, %s344_s27  ;;  %p349_p6 = scmp.lt.s32.totalorder %s231_s26, %s231_s26 }
  0x1b   :  { %280 = vmatpush3.xpose.msk.msra.mxu0 %vm59_vm0, %v46_v4  ;;  %319 = vset.pattern.permute.xlu0 %v373_v10  ;;  %p350_p7 = scmp.lt.s32.totalorder %s348_s28, %s344_s27 }
  0x1c   :  { %281 = vmatprep.subr.msk.mxu0 %vm59_vm0, %v45_v7  ;;  %209 = vperm.xlu0 %319, %v29_v6  }
  0x1d   :  { %p351_p8 = por %p350_p7, %p349_p6 }
  0x1f   :  { %282 = vmatpush3.xpose.msk.msra.mxu0 %vm59_vm0, %v45_v7  ;;  %p352_p9 = pnand %p351_p8, %p345_p5 }
  0x20   :  { %283 = vmatprep.subr.msk.mxu0 %vm59_vm0, %v44_v9 }
  0x23   :  { %284 = vmatpush3.xpose.msk.msra.mxu0 %vm59_vm0, %v44_v9 }
  0x24   :  { %285 = vmatprep.subr.msk.mxu0 %vm59_vm0, %v43_v11 }
  0x27   :  { %286 = vmatpush3.xpose.msk.msra.mxu0 %vm59_vm0, %v43_v11 }
  0x28   :  { %287 = vmatprep.subr.msk.mxu0 %vm59_vm0, %v42_v12 }
  0x2b   :  { %288 = vmatpush3.xpose.msk.msra.mxu0 %vm59_vm0, %v42_v12 }
  0x2c   :  { %289 = vmatprep.subr.msk.mxu0 %vm59_vm0, %v41_v13 }
  0x2f   :  { %290 = vmatpush3.xpose.msk.msra.mxu0 %vm59_vm0, %v41_v13 }
  0x30   :  { %291 = vmatprep.subr.msk.mxu0 %vm59_vm0, %v40_v14 }
  0x33   :  { %292 = vmatpush3.xpose.msk.msra.mxu0 %vm59_vm0, %v40_v14 }
  0x34   :  { %293 = vmatprep.subr.msk.mxu0 %vm59_vm0, %v39_v15 }
  0x37   :  { %294 = vmatpush3.xpose.msk.msra.mxu0 %vm59_vm0, %v39_v15 }
  0x38   :  { %295 = vmatprep.subr.msk.mxu0 %vm59_vm0, %v38_v16 }
  0x3b   :  { %296 = vmatpush3.xpose.msk.msra.mxu0 %vm59_vm0, %v38_v16 }
  0x3c   :  { %297 = vmatprep.subr.msk.mxu0 %vm59_vm0, %v37_v17 }
  0x3f   :  { %298 = vmatpush3.xpose.msk.msra.mxu0 %vm59_vm0, %v37_v17 }
  0x40   :  { %299 = vmatprep.subr.msk.mxu0 %vm59_vm0, %v36_v18 }
  0x43   :  { %300 = vmatpush3.xpose.msk.msra.mxu0 %vm59_vm0, %v36_v18 }
  0x44   :  { %301 = vmatprep.subr.msk.mxu0 %vm59_vm0, %v35_v19 }
  0x47   :  { %302 = vmatpush3.xpose.msk.msra.mxu0 %vm59_vm0, %v35_v19 }
  0x48   :  { %303 = vmatprep.subr.msk.mxu0 %vm59_vm0, %v34_v20 }
  0x4b   :  { %304 = vmatpush3.xpose.msk.msra.mxu0 %vm59_vm0, %v34_v20 }
  0x4c   :  { %305 = vmatprep.subr.msk.mxu0 %vm59_vm0, %v33_v21 }
  0x4f   :  { %306 = vmatpush3.xpose.msk.msra.mxu0 %vm59_vm0, %v33_v21 }
  0x52   :  { %308 = vmatmul.mubr.msk.f32.vlgmr.msra.gmra.mxu0 %vm59_vm0, %v32_v22 }
  0x8e   :  { %v52_v23 = vpop.permute.xlu0 %51 }
  0x8f   :  { %v193_v24 = vpop.permute.xlu1 %192 }
  0x92   :  { %v57_v25 = vpop.permute.xlu0 %56 }
  0x93   :  { %v197_v32 = vpop.permute.xlu1 %196 }
  0x97   :  { %v210_v41 = vpop.permute.xlu0 %209 }
 0x112   :  { %v309_v26 = vpop.f32.mrf.mxu0 }
 0x113   :  { %v186_v27 = vadd.f32 %v309_v26, %v57_v25 }
 0x114   :  { %v180_v28 = vpop.f32.mrf.mxu0 }
 0x115   :  { %v190_v29 = vmax.f32 %v186_v27, 0.0  ;;  %v181_v30 = vadd.f32 %v180_v28, %v52_v23 }
 0x117   :  { %v189_v31 = vmax.f32 %v181_v30, 0.0  ;;  %v200_v34 = vmul.f32 %v197_v32, %v190_v29 }
 0x119   :  { %v199_v33 = vmul.f32 %v193_v24, %v189_v31 }
 0x11b   :  { %v201_v35 = vadd.f32 %v200_v34, %v199_v33 }
 0x11d   :  { %v202_v36 = vrot.slane %v201_v35, 4 }
 0x11f   :  { %v203_v37 = vadd.f32 %v202_v36, %v201_v35 }
 0x121   :  { %v204_v38 = vrot.slane %v203_v37, 2 }
 0x123   :  { %v205_v39 = vadd.f32 %v204_v38, %v203_v37 }
 0x125   :  { %v206_v40 = vrot.slane %v205_v39, 1 }
 0x127   :  { %v207_v42 = vadd.f32 %v206_v40, %v205_v39 }
 0x129   :  { %v212_v43 = vadd.f32 %v210_v41, %v207_v42 }
 0x12b   :  { %v213_v44 = vand.u32 2147483647, %v212_v43  ;;  %vm220_vm1 = vcmp.ge.f32.partialorder %v212_v43, 0.0 }
 0x12d   :  { %v214_v45 = vsub.f32 0.0, %v213_v44 }
 0x12f   :  { %v215_v46 = vmul.f32 1.442695, %v214_v45 }
 0x131   :  { %320 = vpow2.f32 %v215_v46 }
 0x13e   :  { %v321_v47 = vpop.eup %320 }
 0x13f   :  { %v217_v48 = vadd.f32 1.0, %v321_v47 }
 0x141   :  { %322 = vrcp.f32 %v217_v48 }
 0x14e   :  { %v323_v49 = vpop.eup %322 }
 0x14f   :  { %v221_v50 = vmul.f32 %v323_v49, %v321_v47 }
 0x151   :  { %v222_v51 = vsel %vm220_vm1, %v323_v49, %v221_v50 }
 0x152   :  { %223 = vst [vmem:[#allocation5] sm:$0x1] %v222_v51 }
 0x153   :  { %355 = shalt.err (!%p352_p9)
}
 0x154   :  { %233 = dma.vmem_to_hbm [thread:$0]  %s231_s26, 16, %s450_s3, [#allocation4]  }
 0x155   :  { %366 = dma.done.wait [#allocation4], 16  }
 0x156   :  { %367 = vsyncadd [#allocation4], 4294967280 }
 0x157   :  { %237 = vsyncpa [#allocation3], 1 }
 0x158   :  { %238 = vsyncpa [#allocation4], 1 }

</bundles_post_ra>
